<compile_context>
chip_gen: v7x
topology: tpu7x:2x2x1
jax: 0.10.0
libtpu: 0.0.40
codegen_flags: <defaults>
</compile_context>

<pallas_src>
import functools

import jax
import jax.numpy as jnp
from jax.experimental import pallas as pl
from jax.experimental.pallas import tpu as pltpu

_VMEM_LIMIT = 32 * 1024 * 1024  # safe on v5e/v6e/v7x


# -----------------------------------------------------------------------------
# activation helpers (match torch nn.ReLU / nn.ELU / nn.SELU / nn.GELU)
# -----------------------------------------------------------------------------
def _apply_act(x, name):
    name = name.lower()
    if name == "relu":
        return jnp.maximum(x, 0.0)
    if name == "elu":
        xm = jnp.minimum(x, 0.0)  # keep discarded branch finite
        return jnp.where(x > 0, x, jnp.exp(xm) - 1.0)
    if name == "selu":
        alpha = 1.6732632423543772
        scale = 1.0507009873554805
        xm = jnp.minimum(x, 0.0)
        return scale * jnp.where(x > 0, x, alpha * (jnp.exp(xm) - 1.0))
    if name == "gelu":  # torch default GELU = exact erf form
        return 0.5 * x * (1.0 + jax.lax.erf(x * 0.7071067811865476))
    raise ValueError("activation must be one of relu, elu, selu, gelu")


# -----------------------------------------------------------------------------
# tile-size helpers
# -----------------------------------------------------------------------------
def _pick_tile(total, cap):
    """Largest multiple-of-128 divisor of `total` that is <= cap, else full `total`."""
    best = None
    t = 128
    limit = min(total, cap)
    while t <= limit:
        if total % t == 0:
            best = t
        t += 128
    return best if best is not None else total


def _conv_hw_tile(hw, depth):
    # double-buffered x, eps, z, mean, logvar tiles: ~10 * depth * 4 bytes per lane col
    budget = 8 * 1024 * 1024
    cap = budget // (40 * max(depth, 1))
    cap = max(128, min(4096, (cap // 128) * 128))
    return _pick_tile(hw, cap)


def _vec_k_tile(n, batch, hidden):
    # double-buffered x-row + W-row per contraction lane: 2 * 4B * (B + 2*hidden)
    per_lane = 8 * (batch + 2 * hidden)
    cap = (6 * 1024 * 1024) // max(per_lane, 1)
    cap = max(128, min(2048, (cap // 128) * 128))
    return _pick_tile(n, cap)


def _vec_j_tile(n, batch, hidden):
    # double-buffered W_ff col + bias + output per output lane
    per_lane = 8 * (hidden + 1 + batch)
    cap = (6 * 1024 * 1024) // max(per_lane, 1)
    cap = max(128, min(2048, (cap // 128) * 128))
    return _pick_tile(n, cap)


# -----------------------------------------------------------------------------
# parameters_map_type == 0 : fused 1x1-conv heads + reparametrize
#   layout: (B, D, H*W)  — channels on sublane, spatial on lane (lane-dense I/O)
# -----------------------------------------------------------------------------
def _sample_conv_kernel(x_ref, w_ref, b_ref, eps_ref,
                        z_ref, mean_ref, logvar_ref, *, use_act, act, depth):
    x = x_ref[0]                                   # (D, hw_tile)
    if use_act:
        x = _apply_act(x, act)
    # fused heads: W is (2D, D), rows [0:D] -> mean head, rows [D:2D] -> logvar head
    out = jnp.dot(w_ref[...], x, preferred_element_type=jnp.float32) + b_ref[...]
    mean = out[:depth, :]
    logvar = out[depth:, :]
    sigma = jnp.exp(0.5 * logvar)
    z = mean + sigma * eps_ref[0]
    z_ref[0] = z
    mean_ref[0] = mean
    logvar_ref[0] = logvar


def sample_layer_conv_forward(x_nchw, params, eps_nchw, *, use_act, act):
    """Conv path: returns (z, mean, log_var), each B x D x H x W (NCHW)."""
    B, D, H, W = x_nchw.shape
    HW = H * W
    hw_tile = _conv_hw_tile(HW, D)

    # free reshapes — no transposes
    x3 = x_nchw.reshape(B, D, HW)
    eps3 = eps_nchw.reshape(B, D, HW)

    w, b = params["w"], params["b"]                # (2D, D), (2D, 1)

    kernel = functools.partial(_sample_conv_kernel, use_act=use_act, act=act, depth=D)
    tile_spec = pl.BlockSpec((1, D, hw_tile), lambda bi, j: (bi, 0, j))
    z, mean, logvar = pl.pallas_call(
        kernel,
        out_shape=(
            jax.ShapeDtypeStruct((B, D, HW), jnp.float32),
            jax.ShapeDtypeStruct((B, D, HW), jnp.float32),
            jax.ShapeDtypeStruct((B, D, HW), jnp.float32),
        ),
        grid_spec=pltpu.PrefetchScalarGridSpec(
            num_scalar_prefetch=0,
            grid=(B, HW // hw_tile),
            in_specs=[
                tile_spec,                                      # x
                pl.BlockSpec((2 * D, D), lambda bi, j: (0, 0)),  # fused W (resident)
                pl.BlockSpec((2 * D, 1), lambda bi, j: (0, 0)),  # fused bias
                tile_spec,                                      # eps
            ],
            out_specs=[tile_spec, tile_spec, tile_spec],
        ),
        compiler_params=pltpu.CompilerParams(
            dimension_semantics=("parallel", "parallel"),
            vmem_limit_bytes=_VMEM_LIMIT,
        ),
    )(x3, w, b, eps3)

    shape = (B, D, H, W)
    return z.reshape(shape), mean.reshape(shape), logvar.reshape(shape)


# -----------------------------------------------------------------------------
# parameters_map_type == 1 : fused Linear heads (streamed over N) + reparametrize,
# then ff_layer streamed over the N output columns
# -----------------------------------------------------------------------------
def _vector_heads_kernel(x_ref, w_ref, b_ref, eps_ref,
                         z_ref, mean_ref, logvar_ref, acc_ref, *, use_act, act, hidden):
    k = pl.program_id(0)

    @pl.when(k == 0)
    def _():
        acc_ref[...] = jnp.zeros_like(acc_ref)

    x = x_ref[...]                                  # (B, nk)
    if use_act:
        x = _apply_act(x, act)
    acc_ref[...] += jnp.dot(x, w_ref[...], preferred_element_type=jnp.float32)

    @pl.when(k == pl.num_programs(0) - 1)
    def _():
        out = acc_ref[...] + b_ref[...]             # (B, 2*hidden)
        mean = out[:, :hidden]
        logvar = out[:, hidden:]
        z = mean + jnp.exp(0.5 * logvar) * eps_ref[...]
        z_ref[...] = z
        mean_ref[...] = mean
        logvar_ref[...] = logvar


def _vector_ff_kernel(z_ref, w_ref, b_ref, y_ref, *, use_act, act):
    y = jnp.dot(z_ref[...], w_ref[...], preferred_element_type=jnp.float32) + b_ref[...]
    if use_act:
        y = _apply_act(y, act)
    y_ref[...] = y


def sample_layer_vector_forward(x_nchw, params, eps_bh, *, use_act, act, hidden):
    """Vector path: returns (x_out NCHW, mean (B,hidden), log_var (B,hidden))."""
    B, D, H, W = x_nchw.shape
    N = D * H * W
    x_flat = x_nchw.reshape(B, N)                   # == torch x.flatten(1)

    w_heads, b_heads = params["w_heads"], params["b_heads"]   # (N, 2H), (1, 2H)
    wff, bff = params["wff"], params["bff"]                   # (hidden, N), (1, N)

    # ---- phase 1: fused mu/sigma heads, streamed over the N contraction axis ----
    nk = _vec_k_tile(N, B, hidden)
    heads_kernel = functools.partial(_vector_heads_kernel,
                                     use_act=use_act, act=act, hidden=hidden)
    z, mean, logvar = pl.pallas_call(
        heads_kernel,
        out_shape=(
            jax.ShapeDtypeStruct((B, hidden), jnp.float32),
            jax.ShapeDtypeStruct((B, hidden), jnp.float32),
            jax.ShapeDtypeStruct((B, hidden), jnp.float32),
        ),
        grid_spec=pltpu.PrefetchScalarGridSpec(
            num_scalar_prefetch=0,
            grid=(N // nk,),
            in_specs=[
                pl.BlockSpec((B, nk), lambda k: (0, k)),           # x tile
                pl.BlockSpec((nk, 2 * hidden), lambda k: (k, 0)),  # W_heads tile
                pl.BlockSpec((1, 2 * hidden), lambda k: (0, 0)),   # bias (resident)
                pl.BlockSpec((B, hidden), lambda k: (0, 0)),       # eps (resident)
            ],
            out_specs=[
                pl.BlockSpec((B, hidden), lambda k: (0, 0)),
                pl.BlockSpec((B, hidden), lambda k: (0, 0)),
                pl.BlockSpec((B, hidden), lambda k: (0, 0)),
            ],
            scratch_shapes=[pltpu.VMEM((B, 2 * hidden), jnp.float32)],
        ),
        compiler_params=pltpu.CompilerParams(
            dimension_semantics=("arbitrary",),
            vmem_limit_bytes=_VMEM_LIMIT,
        ),
    )(x_flat, w_heads, b_heads, eps_bh)

    # ---- phase 2: ff_layer, W_ff streamed over its N output columns ----
    nj = _vec_j_tile(N, B, hidden)
    ff_kernel = functools.partial(_vector_ff_kernel, use_act=use_act, act=act)
    x_out_flat = pl.pallas_call(
        ff_kernel,
        out_shape=jax.ShapeDtypeStruct((B, N), jnp.float32),
        grid_spec=pltpu.PrefetchScalarGridSpec(
            num_scalar_prefetch=0,
            grid=(N // nj,),
            in_specs=[
                pl.BlockSpec((B, hidden), lambda j: (0, 0)),       # z (resident)
                pl.BlockSpec((hidden, nj), lambda j: (0, j)),      # W_ff tile
                pl.BlockSpec((1, nj), lambda j: (0, j)),           # bias tile
            ],
            out_specs=pl.BlockSpec((B, nj), lambda j: (0, j)),
        ),
        compiler_params=pltpu.CompilerParams(
            dimension_semantics=("parallel",),
            vmem_limit_bytes=_VMEM_LIMIT,
        ),
    )(z, wff, bff)

    x_out = x_out_flat.reshape(-1, D, H, W)  # self.input_shape with leading -1
    return x_out, mean, logvar


# -----------------------------------------------------------------------------
# deterministic parameter init (shapes follow the nn.Module __init__)
# -----------------------------------------------------------------------------
def init_conv_params(key, depth):
    # torch nn.Conv2d(depth, 2*depth, 1): weight (2D, D, 1, 1), bias (2D,)
    # packed: rows [0:D] = mean head, rows [D:2D] = logvar head (matches chunk(2, 1))
    k1, k2 = jax.random.split(key, 2)
    s = 1.0 / jnp.sqrt(depth)
    return {
        "w": jax.random.uniform(k1, (2 * depth, depth), jnp.float32, -s, s),
        "b": jax.random.uniform(k2, (2 * depth, 1), jnp.float32, -s, s),
    }


def init_vector_params(key, n_in, hidden):
    # map_mu / map_sigma: Linear(n_in, hidden)  -> packed (n_in, 2*hidden)
    # ff_layer: Linear(hidden, n_in)
    ks = jax.random.split(key, 4)
    s_in = 1.0 / jnp.sqrt(n_in)
    s_h = 1.0 / jnp.sqrt(hidden)
    return {
        "w_heads": jax.random.uniform(ks[0], (n_in, 2 * hidden), jnp.float32, -s_in, s_in),
        "b_heads": jax.random.uniform(ks[1], (1, 2 * hidden), jnp.float32, -s_in, s_in),
        "wff": jax.random.uniform(ks[2], (hidden, n_in), jnp.float32, -s_h, s_h),
        "bff": jax.random.uniform(ks[3], (1, n_in), jnp.float32, -s_h, s_h),
    }


# -----------------------------------------------------------------------------
if __name__ == "__main__":
    key = jax.random.PRNGKey(0)
    k_x, k_p0, k_p1, k_e0, k_e1 = jax.random.split(key, 5)

    B, D, H, W = 2, 4, 16, 16
    hidden = 32
    x = jax.random.normal(k_x, (B, D, H, W), jnp.float32)

    # ---- parameters_map_type = 0 (convolution path) ----
    cfg0 = {"parameters_map_type": 0,
            "use_activation_in_sampling": True,
            "sampling_activation": "elu"}
    p0 = init_conv_params(k_p0, D)
    eps0 = jax.random.normal(k_e0, (B, D, H, W), jnp.float32)  # randn_like(sigma)
    z, mean0, logvar0 = sample_layer_conv_forward(
        x, p0, eps0,
        use_act=cfg0["use_activation_in_sampling"],
        act=cfg0["sampling_activation"])
    jax.block_until_ready((z, mean0, logvar0))
    assert z.shape == (B, D, H, W) and mean0.shape == (B, D, H, W)
    assert logvar0.shape == (B, D, H, W)

    # ---- parameters_map_type = 1 (feed-forward / vector path) ----
    cfg1 = {"parameters_map_type": 1,
            "use_activation_in_sampling": True,
            "sampling_activation": "elu"}
    p1 = init_vector_params(k_p1, D * H * W, hidden)
    eps1 = jax.random.normal(k_e1, (B, hidden), jnp.float32)
    x_out, mean1, logvar1 = sample_layer_vector_forward(
        x, p1, eps1,
        use_act=cfg1["use_activation_in_sampling"],
        act=cfg1["sampling_activation"],
        hidden=hidden)
    jax.block_until_ready((x_out, mean1, logvar1))
    assert x_out.shape == (B, D, H, W)
    assert mean1.shape == (B, hidden) and logvar1.shape == (B, hidden)

    print("KERNEL_OK")
</pallas_src>

<mosaic_0001>
module attributes {stable_mosaic.version = 11 : i64} {
  func.func @_sample_conv_kernel(%arg0: i32, %arg1: i32, %arg2: memref<1x4x256xf32, #tpu.memory_space<vmem>>, %arg3: memref<8x4xf32, #tpu.memory_space<vmem>>, %arg4: memref<8x1xf32, #tpu.memory_space<vmem>>, %arg5: memref<1x4x256xf32, #tpu.memory_space<vmem>>, %arg6: memref<1x4x256xf32, #tpu.memory_space<vmem>>, %arg7: memref<1x4x256xf32, #tpu.memory_space<vmem>>, %arg8: memref<1x4x256xf32, #tpu.memory_space<vmem>>) attributes {dimension_semantics = [#tpu.dimension_semantics<parallel>, #tpu.dimension_semantics<parallel>], iteration_bounds = array<i64: 2, 1>, scalar_prefetch = 0 : i64, scratch_operands = 0 : i64, tpu.core_type = #tpu.core_type<tc>, window_params = [{transform_indices = @transform_0, window_bounds = array<i64: 1, 4, 256>}, {pipeline_mode = #tpu.pipeline_mode<synchronous>, transform_indices = @transform_1, window_bounds = array<i64: 8, 4>}, {pipeline_mode = #tpu.pipeline_mode<synchronous>, transform_indices = @transform_2, window_bounds = array<i64: 8, 1>}, {transform_indices = @transform_3, window_bounds = array<i64: 1, 4, 256>}, {transform_indices = @transform_4, window_bounds = array<i64: 1, 4, 256>}, {transform_indices = @transform_5, window_bounds = array<i64: 1, 4, 256>}, {transform_indices = @transform_6, window_bounds = array<i64: 1, 4, 256>}]} {
    %c0 = arith.constant 0 : index
    %c0_0 = arith.constant 0 : index
    %c0_1 = arith.constant 0 : index
    %0 = vector.load %arg2[%c0, %c0_0, %c0_1] : memref<1x4x256xf32, #tpu.memory_space<vmem>>, vector<1x4x256xf32>
    %1 = vector.shape_cast %0 : vector<1x4x256xf32> to vector<4x256xf32>
    %cst = arith.constant 0.000000e+00 : f32
    %2 = vector.broadcast %cst : f32 to vector<4x256xf32>
    %3 = arith.minimumf %1, %2 : vector<4x256xf32>
    %cst_2 = arith.constant 0.000000e+00 : f32
    %4 = vector.broadcast %cst_2 : f32 to vector<4x256xf32>
    %5 = arith.cmpf ogt, %1, %4 : vector<4x256xf32>
    %6 = math.exp %3 : vector<4x256xf32>
    %cst_3 = arith.constant 1.000000e+00 : f32
    %7 = vector.broadcast %cst_3 : f32 to vector<4x256xf32>
    %8 = arith.subf %6, %7 : vector<4x256xf32>
    %9 = arith.select %5, %1, %8 : vector<4x256xi1>, vector<4x256xf32>
    %c0_4 = arith.constant 0 : index
    %c0_5 = arith.constant 0 : index
    %10 = vector.load %arg3[%c0_4, %c0_5] : memref<8x4xf32, #tpu.memory_space<vmem>>, vector<8x4xf32>
    %cst_6 = arith.constant dense<0.000000e+00> : vector<8x256xf32>
    %11 = tpu.matmul %10, %9, %cst_6 {dimension_numbers = #tpu.dot_dimension_numbers<[1], [0], [0], [1], [0, 0, 1, 1], [], []>} : vector<8x4xf32>, vector<4x256xf32>, vector<8x256xf32> -> vector<8x256xf32>
    %c0_7 = arith.constant 0 : index
    %c0_8 = arith.constant 0 : index
    %12 = vector.load %arg4[%c0_7, %c0_8] : memref<8x1xf32, #tpu.memory_space<vmem>>, vector<8x1xf32>
    %13 = vector.broadcast %12 : vector<8x1xf32> to vector<8x256xf32>
    %14 = arith.addf %11, %13 : vector<8x256xf32>
    %15 = vector.extract_strided_slice %14 {offsets = [0, 0], sizes = [4, 256], strides = [1, 1]} : vector<8x256xf32> to vector<4x256xf32>
    %16 = vector.extract_strided_slice %14 {offsets = [4, 0], sizes = [4, 256], strides = [1, 1]} : vector<8x256xf32> to vector<4x256xf32>
    %cst_9 = arith.constant 5.000000e-01 : f32
    %17 = vector.broadcast %cst_9 : f32 to vector<4x256xf32>
    %18 = arith.mulf %17, %16 : vector<4x256xf32>
    %19 = math.exp %18 : vector<4x256xf32>
    %c0_10 = arith.constant 0 : index
    %c0_11 = arith.constant 0 : index
    %c0_12 = arith.constant 0 : index
    %20 = vector.load %arg5[%c0_10, %c0_11, %c0_12] : memref<1x4x256xf32, #tpu.memory_space<vmem>>, vector<1x4x256xf32>
    %21 = vector.shape_cast %20 : vector<1x4x256xf32> to vector<4x256xf32>
    %22 = arith.mulf %19, %21 : vector<4x256xf32>
    %23 = arith.addf %15, %22 : vector<4x256xf32>
    %c0_13 = arith.constant 0 : index
    %c0_14 = arith.constant 0 : index
    %c0_15 = arith.constant 0 : index
    %24 = vector.load %arg6[%c0_13, %c0_14, %c0_15] : memref<1x4x256xf32, #tpu.memory_space<vmem>>, vector<1x4x256xf32>
    %25 = vector.shape_cast %24 : vector<1x4x256xf32> to vector<4x256xf32>
    %26 = vector.shape_cast %23 : vector<4x256xf32> to vector<1x4x256xf32>
    tpu.vector_store %arg6[%c0_13, %c0_14, %c0_15], %26 {strides = array<i32>} : memref<1x4x256xf32, #tpu.memory_space<vmem>>, vector<1x4x256xf32>,
    %c0_16 = arith.constant 0 : index
    %c0_17 = arith.constant 0 : index
    %c0_18 = arith.constant 0 : index
    %27 = vector.load %arg7[%c0_16, %c0_17, %c0_18] : memref<1x4x256xf32, #tpu.memory_space<vmem>>, vector<1x4x256xf32>
    %28 = vector.shape_cast %27 : vector<1x4x256xf32> to vector<4x256xf32>
    %29 = vector.shape_cast %15 : vector<4x256xf32> to vector<1x4x256xf32>
    tpu.vector_store %arg7[%c0_16, %c0_17, %c0_18], %29 {strides = array<i32>} : memref<1x4x256xf32, #tpu.memory_space<vmem>>, vector<1x4x256xf32>,
    %c0_19 = arith.constant 0 : index
    %c0_20 = arith.constant 0 : index
    %c0_21 = arith.constant 0 : index
    %30 = vector.load %arg8[%c0_19, %c0_20, %c0_21] : memref<1x4x256xf32, #tpu.memory_space<vmem>>, vector<1x4x256xf32>
    %31 = vector.shape_cast %30 : vector<1x4x256xf32> to vector<4x256xf32>
    %32 = vector.shape_cast %16 : vector<4x256xf32> to vector<1x4x256xf32>
    tpu.vector_store %arg8[%c0_19, %c0_20, %c0_21], %32 {strides = array<i32>} : memref<1x4x256xf32, #tpu.memory_space<vmem>>, vector<1x4x256xf32>,
    return
  }
  func.func @transform_0(%arg0: i32, %arg1: i32) -> (i32, i32, i32) {
    %c0_i32 = arith.constant 0 : i32
    %c0_i32_0 = arith.constant 0 : i32
    return %arg0, %c0_i32, %arg1 : i32, i32, i32
  }
  func.func @transform_1(%arg0: i32, %arg1: i32) -> (i32, i32) {
    %c0_i32 = arith.constant 0 : i32
    %c0_i32_0 = arith.constant 0 : i32
    %c0_i32_1 = arith.constant 0 : i32
    return %c0_i32, %c0_i32_0 : i32, i32
  }
  func.func @transform_2(%arg0: i32, %arg1: i32) -> (i32, i32) {
    %c0_i32 = arith.constant 0 : i32
    %c0_i32_0 = arith.constant 0 : i32
    %c0_i32_1 = arith.constant 0 : i32
    return %c0_i32, %c0_i32_0 : i32, i32
  }
  func.func @transform_3(%arg0: i32, %arg1: i32) -> (i32, i32, i32) {
    %c0_i32 = arith.constant 0 : i32
    %c0_i32_0 = arith.constant 0 : i32
    return %arg0, %c0_i32, %arg1 : i32, i32, i32
  }
  func.func @transform_4(%arg0: i32, %arg1: i32) -> (i32, i32, i32) {
    %c0_i32 = arith.constant 0 : i32
    %c0_i32_0 = arith.constant 0 : i32
    return %arg0, %c0_i32, %arg1 : i32, i32, i32
  }
  func.func @transform_5(%arg0: i32, %arg1: i32) -> (i32, i32, i32) {
    %c0_i32 = arith.constant 0 : i32
    %c0_i32_0 = arith.constant 0 : i32
    return %arg0, %c0_i32, %arg1 : i32, i32, i32
  }
  func.func @transform_6(%arg0: i32, %arg1: i32) -> (i32, i32, i32) {
    %c0_i32 = arith.constant 0 : i32
    %c0_i32_0 = arith.constant 0 : i32
    return %arg0, %c0_i32, %arg1 : i32, i32, i32
  }
}

</mosaic_0001>

<bundles_post_ra>
// kernel: tpu_custom_call.1
= control target key start
LH: loop header
LB: loop body
LE: loop exit
PB: predicated region body
PF: predicated region fallthrough
CT: control target
= control target key end

     0   :  { %s1205_s0 = inlined_call_operand.vmem [shape: f32[2,4,256], index: 0, kind: input, shape index: {}]   ;;  %s1206_s1 = inlined_call_operand.vmem [shape: f32[8,4], index: 1, kind: input, shape index: {}]   ;;  %s1207_s2 = inlined_call_operand.vmem [shape: f32[8,1], index: 2, kind: input, shape index: {}]   ;;  %s1208_s3 = inlined_call_operand.vmem [shape: f32[2,4,256], index: 3, kind: input, shape index: {}]   ;;  %s1209_s4 = inlined_call_operand.hbm [shape: f32[2,4,256], index: 4, kind: output, shape index: {0}]   ;;  %s1210_s5 = inlined_call_operand.hbm [shape: f32[2,4,256], index: 5, kind: output, shape index: {1}]   ;;  %s1211_s6 = inlined_call_operand.hbm [shape: f32[2,4,256], index: 6, kind: output, shape index: {2}]  }
   0x1   :  { %1215 = sst [smem:[#allocation10_spill]] %s1205_s0 }
   0x2   :  { %1216 = sst [smem:[#allocation11_spill]] %s1206_s1 }
   0x3   :  { %1217 = sst [smem:[#allocation12_spill]] %s1207_s2 }
   0x4   :  { %12 = vsyncpa [#allocation3], 0 }
   0x5   :  { %14 = vsyncpa [#allocation3 + $0x1], 0 }
   0x6   :  { %15 = vsyncpa [#allocation5], 0 }
   0x7   :  { %17 = vsyncpa [#allocation5 + $0x1], 0  ;;  %s977_s21 = smov 0   ;;  %s979_s22 = smov 0  }
   0x8   :  { %s981_s23 = smov 0   ;;  %s983_s24 = smov 0  }
   0x9   :  { %s985_s25 = smov 0   ;;  %s987_s26 = smov 0  }
   0xa LB: > { %s690_s27 = sadd.s32 4294967295, %s935_s26   ;;  %s1212_s28 = sadd.s32 4294967294, %s935_s26   ;;  %s935_s26 = sphi %s987_s26, %s23_s26   ;;  %s931_s25 = sphi %s985_s25, %s1231_s25   ;;  %s927_s24 = sphi %s983_s24, %s1230_s24   ;;  %s923_s23 = sphi %s981_s23, %s1229_s23   ;;  %s919_s22 = sphi %s979_s22, %s1228_s22   ;;  %s915_s21 = sphi %s977_s21, %s1227_s21  }
   0xb   : > { %s35_s29 = sadd.s32 1, %s931_s25  ;;  %s142_s30 = sadd.s32 1, %s923_s23 }
   0xc   : > { %p37_p0 = scmp.ge.s32.totalorder %s35_s29, 2  ;;  %p152_p1 = scmp.ne.s32.totalorder %s923_s23, %s919_s22 }
   0xd   : > { %p153_p2 = scmp.eq.s32.totalorder %s690_s27, 1  ;;  %p158_p3 = scmp.ne.s32.totalorder %s919_s22, %s915_s21 }
   0xe   : > { %s1233_s29 = smov (%p37_p0, %s35_s29), 0  ;;  %p159_p5 = scmp.eq.s32.totalorder %s1212_s28, 1 }
   0xf   : > { %1218 = sst [smem:[#allocation9_spill]] %s1233_s29  ;;  %p1019_p4 = por %p153_p2, %p152_p1 }
  0x10   : > { %s137_s8 = ssub.s32 %s931_s25, %s1233_s29  ;;  %p694_p6 = scmp.ge.s32.totalorder %s935_s26, 1 }
  0x11   : > { %p140_p7 = scmp.eq.s32.totalorder %s137_s8, 0  ;;  %p1028_p8 = por %p159_p5, %p158_p3 }
  0x12   : > { %p265_p9 = scmp.lt.s32.totalorder %s935_s26, 3 }
  0x13   : > { %s1034_s10 = scalar_select %p140_p7, %s923_s23, %s142_s30  }
  0x14   : > { %p266_p10 = pnand %p694_p6, %p265_p9 }
  0x15   : > { %p319_p11 = scmp.lt.s32.totalorder (!%p266_p10), %s927_s24, 1  ;;  %v937_v0 = vmov (!%p266_p10), 0.0   ;;  %v938_v1 = vmov (!%p266_p10), 0   ;;  %s1221_s2 = sld [smem:[#allocation12_spill]] (!%p266_p10)  ;;  %vm361_vm1 = vcmask (!%p266_p10), 1043456   ;;  %vm357_vm2 = vcmask (!%p266_p10), 31744  }
  0x16   : > { %269 = sbr.rel (%p266_p10) target bundleno = 335 (0x14f), region = 36  ;;  %430 = vmatprep.mubr.f32.mxu0 (!%p266_p10), %v937_v0  ;;  %789 = vset.pattern.permute.xlu0 (!%p266_p10), %v938_v1  ;;  %s1222_s0 = sld [smem:[#allocation10_spill]] (!%p266_p10) }
  0x17   : > { %s1223_s1 = sld [smem:[#allocation11_spill]] (!%p266_p10)  ;;  %s1213_s20 = sand.u32 (!%p266_p10), 1, %s919_s22  }
  0x18   : > { %s1055_s30 = sshll.u32 (!%p266_p10), %s1213_s20, 3  ;;  %s1059_s8 = sand.u32 (!%p266_p10), 1, %s690_s27  }
  0x19   : > { %s1064_s11 = sshll.u32 (!%p266_p10), %s927_s24, 7  ;;  %s310_s12 = scalar_lea.vmem (!%p266_p10), [#allocation4], %s1055_s30 }
  0x1a   : > { %s513_s15 = sshll.u32 (!%p266_p10), %s310_s12, 4  ;;  %s317_s16 = scalar_lea.vmem (!%p266_p10), [#allocation6], %s1055_s30  ;;  %s1080_s15 = int_to_ptr.vmem [resolvable:$true] %s513_s15 }
  0x1b   : > { %v349_v2 = vld [vmem:[%s1221_s2] sm:$0xff] (!%p266_p10)  ;;  %s1078_s18 = scalar_lea.hbm (!%p266_p10), %s1210_s5, %s1064_s11  ;;  %s1088_s20 = scalar_lea.hbm (!%p266_p10), %s1211_s6, %s1064_s11 }
  0x1c   : > { %352 = vperm.xlu0 (!%p266_p10), %789, %v349_v2   ;;  %s797_s2 = scalar_lea.vmem (!%p266_p10), %s1080_s15, 128  ;;  %s939_s28 = smov (!%p266_p10), [#allocation4]  }
  0x1d   : > { %s1041_s13 = scalar_select %p319_p11, %s927_s24, 1  ;;  %v348_v10 = vld [vmem:[%s1223_s1] sm:$0xff] }
  0x1e   : > { %s476_s1 = scalar_lea.sflag [#allocation5], %s1059_s8  ;;  %p798_p12 = scmp.ne.s32.totalorder %s1080_s15, %s797_s2 }
  0x1f   : > { %s717_s14 = sshll.u32 %s1041_s13, 3  ;;  %s801_s19 = sshll.u32 %s939_s28, 4  ;;  %s802_s19 = int_to_ptr.vmem [resolvable:$false] %s801_s19 }
  0x20   : > { %s326_s17 = scalar_lea.vmem %s1222_s0, %s717_s14  ;;  %s1097_s0 = scalar_lea.vmem %s1208_s3, %s717_s14 }
  0x21   : > { %v341_v3 = vld [vmem:[%s326_s17] sm:$0xff]  ;;  %s529_s17 = sshll.u32 %s317_s16, 4  ;;  %p799_p13 = pnand %p798_p12, %p1019_p4  ;;  %s1090_s17 = int_to_ptr.vmem [resolvable:$true] %s529_s17 }
  0x22   : > { %v342_v4 = vmin.f32 %v341_v3, 0.0  ;;  %vm343_vm0 = vcmp.gt.f32.partialorder %v341_v3, 0.0  ;;  %s803_s29 = scalar_lea.vmem %s802_s19, 256  ;;  %p804_p1 = scmp.lt.s32.totalorder %s1080_s15, %s802_s19 }
  0x23   : > { %p800_p0 = pneg %p799_p13  ;;  %p805_p2 = scmp.lt.s32.totalorder %s803_s29, %s797_s2 }
  0x24   : > { %v344_v5 = vmul.f32 1.442695, %v342_v4 }
  0x25   : > { %p806_p3 = por %p805_p2, %p804_p1 }
  0x26   : > { %791 = vpow2.f32 %v344_v5 }
  0x27   : > { %p807_p5 = pnand %p806_p3, %p800_p0 }
  0x30   : > { %v792_v6 = vpop.eup %791 }
  0x31   : > { %v702_v7 = vadd.f32 -1.0, %v792_v6 }
  0x33   : > { %v347_v8 = vsel %vm343_vm0, %v341_v3, %v702_v7 }
  0x34   : > { %v356_v9 = vcombine.high %v347_v8, %v347_v8 }
  0x36   : > { %703 = vmatprep.subr.msk.mxu0 %vm361_vm1, %v356_v9 }
  0x37   : > { %704 = vmatpush1.msk.msra.mxu0 %vm361_vm1, %v347_v8 }
  0x38   : > { %705 = vmatmul.mubr.msk.f32.vlgmr.msra.gmra.mrb[0].mxu0 %vm357_vm2, %v348_v10 }
  0x9b   : > { %v353_v11 = vpop.permute.xlu0 %352 }
 0x10b   : > { %v432_v12 = vpop.f32.mrb[0].mxu0 }
 0x10c   : > { %v1061_v13 = vadd.f32 %v432_v12, %v353_v11  ;;  %v434_v14 = vpop.f32.mrb[1].mxu0 }
 0x10d   : > { %v1067_v15 = vadd.f32 %v434_v14, %v353_v11 }
 0x10e   : > { %v437_v16 = vmul.f32 0.5, %v1061_v13 }
 0x10f   : > { %v438_v17 = vmul.f32 0.5, %v1067_v15  ;;  %v464_v18 = vcombine.low %v1061_v13, %v1067_v15  ;;  %v467_v19 = vcombine.high %v1061_v13, %v1067_v15 }
 0x110   : > { %v439_v20 = vmul.f32 1.442695, %v437_v16 }
 0x111   : > { %v441_v21 = vmul.f32 1.442695, %v438_v17  ;;  %466 = vst [vmem:[%s310_s12] sm:$0xff] %v464_v18  ;;  %469 = vst [vmem:[%s317_s16] sm:$0xff] %v467_v19 }
 0x112   : > { %793 = vpow2.f32 %v439_v20 }
 0x113   : > { %810 = shalt.err (!%p807_p5)
}
 0x114   : > { %s811_s13 = scalar_lea.hbm %s1078_s18, 128  ;;  %s815_s16 = scalar_lea.hbm %s1210_s5, 256 }
 0x115   : > { %p812_p6 = scmp.ne.s32.totalorder %s1078_s18, %s811_s13  ;;  %p816_p10 = scmp.lt.u32.totalorder %s1078_s18, %s1210_s5 }
 0x116   : > { %p817_p11 = scmp.lt.u32.totalorder %s815_s16, %s811_s13  ;;  %p819_p13 = scmp.lt.u32.totalorder %s811_s13, %s1078_s18 }
 0x117   : > { %p813_p7 = pnand %p812_p6, %p1019_p4 }
 0x118   : > { %p818_p12 = por %p817_p11, %p816_p10 }
 0x119   : > { %p814_p9 = pneg %p813_p7 }
 0x11a   : > { %p820_p0 = por %p819_p13, %p818_p12 }
 0x11c   : > { %p821_p1 = pnand %p820_p0, %p814_p9 }
 0x11e   : > { %824 = shalt.err (!%p821_p1)
}
 0x11f   : > { %723 = dma.vmem_to_hbm [thread:$0]  (%p1019_p4), %s1080_s15, 128, %s1078_s18, %s476_s1   ;;  %795 = vpow2.f32 %v441_v21 }
 0x120   : > { %s825_s2 = scalar_lea.vmem %s1090_s17, 128  ;;  %s940_s29 = smov [#allocation6]  }
 0x121   : > { %p826_p2 = scmp.ne.s32.totalorder %s1090_s17, %s825_s2  ;;  %s829_s28 = sshll.u32 %s940_s29, 4  ;;  %s830_s28 = int_to_ptr.vmem [resolvable:$false] %s829_s28 }
 0x122   : > { %s831_s19 = scalar_lea.vmem %s830_s28, 256  ;;  %p832_p6 = scmp.lt.s32.totalorder %s1090_s17, %s830_s28 }
 0x123   : > { %p827_p3 = pnand %p826_p2, %p1019_p4  ;;  %p833_p7 = scmp.lt.s32.totalorder %s831_s19, %s825_s2 }
 0x125   : > { %p828_p5 = pneg %p827_p3  ;;  %p834_p9 = por %p833_p7, %p832_p6 }
 0x127   : > { %p835_p10 = pnand %p834_p9, %p828_p5 }
 0x129   : > { %838 = shalt.err (!%p835_p10)
}
 0x12a   : > { %s839_s15 = scalar_lea.hbm %s1088_s20, 128  ;;  %s843_s14 = scalar_lea.hbm %s1211_s6, 256 }
 0x12b   : > { %p840_p11 = scmp.ne.s32.totalorder %s1088_s20, %s839_s15  ;;  %p844_p0 = scmp.lt.u32.totalorder %s1088_s20, %s1211_s6 }
 0x12c   : > { %p845_p1 = scmp.lt.u32.totalorder %s843_s14, %s839_s15  ;;  %p847_p3 = scmp.lt.u32.totalorder %s839_s15, %s1088_s20 }
 0x12d   : > { %p841_p12 = pnand %p840_p11, %p1019_p4 }
 0x12e   : > { %p846_p2 = por %p845_p1, %p844_p0 }
 0x12f   : > { %p842_p13 = pneg %p841_p12 }
 0x130   : > { %p848_p5 = por %p847_p3, %p846_p2 }
 0x132   : > { %p849_p6 = pnand %p848_p5, %p842_p13 }
 0x134   : > { %852 = shalt.err (!%p849_p6)
}
 0x135   : > { %724 = dma.vmem_to_hbm [thread:$0]  (%p1019_p4), %s1090_s17, 128, %s1088_s20, %s476_s1   ;;  %v443_v22 = vld [vmem:[%s1097_s0] sm:$0xff]  ;;  %v794_v24 = vpop.eup %793 }
 0x136   : > { %v445_v23 = vcombine.low %v443_v22, %v443_v22  ;;  %v796_v25 = vpop.eup %795  ;;  %s303_s27 = scalar_lea.vmem [#allocation2], %s1055_s30  ;;  %s1154_s0 = scalar_lea.hbm %s1209_s4, %s1064_s11 }
 0x137   : > { %v448_v27 = vmul.f32 %v796_v25, %v443_v22  ;;  %s497_s8 = sshll.u32 %s303_s27, 4  ;;  %s1224_s1 = sand.u32 1, %s919_s22   ;;  %s1156_s8 = int_to_ptr.vmem [resolvable:$true] %s497_s8 }
 0x138   : > { %v447_v26 = vmul.f32 %v794_v24, %v445_v23  ;;  %s471_s20 = scalar_lea.sflag [#allocation3], %s1224_s1  ;;  %s853_s17 = scalar_lea.vmem %s1156_s8, 128 }
 0x139   : > { %v452_v29 = vrot.slane %v448_v27, 4  ;;  %p854_p7 = scmp.ne.s32.totalorder %s1156_s8, %s853_s17  ;;  %s941_s30 = smov [#allocation2]  }
 0x13a   : > { %v451_v28 = vrot.slane %v447_v26, 4  ;;  %s857_s29 = sshll.u32 %s941_s30, 4  ;;  %s858_s29 = int_to_ptr.vmem [resolvable:$false] %s857_s29 }
 0x13b   : > { %v456_v31 = vadd.f32 %v452_v29, %v1067_v15  ;;  %p855_p9 = pnand %p854_p7, %p1019_p4  ;;  %s859_s28 = scalar_lea.vmem %s858_s29, 256 }
 0x13c   : > { %v455_v30 = vadd.f32 %v451_v28, %v1061_v13  ;;  %p860_p11 = scmp.lt.s32.totalorder %s1156_s8, %s858_s29  ;;  %p861_p12 = scmp.lt.s32.totalorder %s859_s28, %s853_s17 }
 0x13d   : > { %p856_p10 = pneg %p855_p9 }
 0x13e   : > { %v459_v32 = vcombine.low %v455_v30, %v456_v31  ;;  %p862_p13 = por %p861_p12, %p860_p11 }
 0x140   : > { %461 = vst [vmem:[%s303_s27] sm:$0xff] %v459_v32  ;;  %p863_p0 = pnand %p862_p13, %p856_p10 }
 0x142   : > { %866 = shalt.err (!%p863_p0)
}
 0x143   : > { %s867_s11 = scalar_lea.hbm %s1154_s0, 128  ;;  %s871_s18 = scalar_lea.hbm %s1209_s4, 256 }
 0x144   : > { %p868_p1 = scmp.ne.s32.totalorder %s1154_s0, %s867_s11  ;;  %p872_p5 = scmp.lt.u32.totalorder %s1154_s0, %s1209_s4 }
 0x145   : > { %p873_p6 = scmp.lt.u32.totalorder %s871_s18, %s867_s11  ;;  %p875_p9 = scmp.lt.u32.totalorder %s867_s11, %s1154_s0 }
 0x146   : > { %p869_p2 = pnand %p868_p1, %p1019_p4 }
 0x147   : > { %p874_p7 = por %p873_p6, %p872_p5 }
 0x148   : > { %p870_p3 = pneg %p869_p2 }
 0x149   : > { %p876_p10 = por %p875_p9, %p874_p7 }
 0x14b   : > { %p877_p11 = pnand %p876_p10, %p870_p3 }
 0x14d   : > { %880 = shalt.err (!%p877_p11)
}
 0x14e   : > { %722 = dma.vmem_to_hbm [thread:$0]  (%p1019_p4), %s1156_s8, 128, %s1154_s0, %s471_s20  }
 0x14f PF: > { %p738_p12 = scmp.ge.s32.totalorder %s935_s26, 2  ;;  %s541_s12 = sand.u32 1, %s915_s21  }
 0x150   : > { %s542_s16 = scalar_lea.sflag [#allocation3], %s541_s12 }
 0x151   : > { %p729_p13 = pnand %p738_p12, %p1028_p8 }
 0x153   : > { %906 = dma.done.wait (!%p729_p13), %s542_s16, 128  }
 0x154   : > { %908 = vsyncadd (!%p729_p13), %s542_s16, 4294967168  ;;  %s1225_s27 = sadd.s32 4294967294, %s935_s26  }
 0x155   : > { %s550_s24 = sand.u32 1, %s1225_s27  }
 0x156   : > { %s551_s2 = scalar_lea.sflag [#allocation5], %s550_s24 }
 0x157   : > { %910 = dma.done.wait (!%p729_p13), %s551_s2, 256  }
 0x158   : > { %912 = vsyncadd (!%p729_p13), %s551_s2, 4294967040  ;;  %s23_s26 = sadd.s32 1, %s935_s26   ;;  %s1226_s7 = sld [smem:[#allocation9_spill]] }
 0x159   : > { %p20_p4 = scmp.ge.s32.totalorder %s23_s26, 4   ;;  %s1227_s21 = smov %s919_s22 }
 0x15a   : > { %s1228_s22 = smov %s923_s23  ;;  %s1229_s23 = smov %s1034_s10 }
 0x15b   : > { %s1230_s24 = smov %s931_s25  ;;  %22 = sbr.rel (!%p20_p4) target bundleno = 10 (0xa), region = 106 }
 0x15e   : > { %s1231_s25 = smov %s1226_s7 }
 0x162   :  { %565 = vsyncpa [#allocation3], 1 }
 0x163   :  { %567 = vsyncpa [#allocation3 + $0x1], 1 }
 0x164   :  { %568 = vsyncpa [#allocation5], 1 }
 0x165   :  { %570 = vsyncpa [#allocation5 + $0x1], 1 }

</bundles_post_ra>
